<compile_context>
chip_gen: v7x
topology: tpu7x:2x2x1
jax: 0.10.0
libtpu: 0.0.40
codegen_flags: <defaults>
</compile_context>

<pallas_src>
import jax
import jax.numpy as jnp
from jax.experimental import pallas as pl
from jax.experimental.pallas import tpu as pltpu

K_PAD = 1024   # fc1 input 991 -> 1024
H_PAD = 128    # hidden width 100 -> 128
OUT_PAD = 128  # output 2 -> 128 (lane-dense store; real cols sliced in wrapper)


def drebin_mlp_kernel(x_ref, w1_ref, wh_ref, w6_ref, b_ref, o_ref):
    """Fused forward: 5x (bf16 matmul -> f32 bias+tanh) + final linear, one tile."""
    h = x_ref[...]                                    # (TM, K_PAD) bf16

    def linear_f32(h_bf16, w_bf16, bias_row):
        acc = jnp.dot(h_bf16, w_bf16, preferred_element_type=jnp.float32)
        return acc + bias_row                         # f32 bias add (VPU)

    # Layer 1: (TM,1024) @ (1024,128)
    h = linear_f32(h, w1_ref[...], b_ref[0:1, :])
    h = jnp.tanh(h).astype(jnp.bfloat16)              # tanh in f32, bf16 for next MXU

    # Layers 2-5: four resident (128,128) weights from the packed slab.
    for i in range(4):
        h = linear_f32(h, wh_ref[i], b_ref[i + 1:i + 2, :])
        h = jnp.tanh(h).astype(jnp.bfloat16)

    # Layer 6 (no activation), f32 output, lane-dense (TM,128) store.
    out = linear_f32(h, w6_ref[...], b_ref[5:6, :])
    o_ref[...] = out


def pack_params(params):
    """Pad + pack f32 params -> (w1 bf16, wh bf16 (4,128,128), w6 bf16, bias f32 (8,128))."""
    (w1, b1), (w2, b2), (w3, b3), (w4, b4), (w5, b5), (w6, b6) = params

    def pad2(w, rows, cols):
        return jnp.pad(w, ((0, rows - w.shape[0]), (0, cols - w.shape[1])))

    w1p = pad2(w1, K_PAD, H_PAD).astype(jnp.bfloat16)
    whp = jnp.stack([pad2(w, H_PAD, H_PAD) for w in (w2, w3, w4, w5)]
                    ).astype(jnp.bfloat16)
    w6p = pad2(w6, H_PAD, OUT_PAD).astype(jnp.bfloat16)

    bias = jnp.zeros((8, OUT_PAD), jnp.float32)       # sublane-aligned bias slab
    for i, b in enumerate((b1, b2, b3, b4, b5, b6)):
        b = b.reshape(-1)
        bias = bias.at[i, :b.shape[0]].set(b)
    return w1p, whp, w6p, bias


def drebin_net5_forward(x, params, *, tm=256):
    """x: (batch, 991) f32/bf16. params: list of (W (in,out), b (out,)) f32."""
    batch, in_features = x.shape
    out_features = params[-1][0].shape[1]

    w1p, whp, w6p, bias = pack_params(params)

    # Pick a batch tile and zero-pad the batch to a multiple of it.
    pb8 = max(8, ((batch + 7) // 8) * 8)
    tm = min(tm, pb8)
    pb = ((batch + tm - 1) // tm) * tm
    xp = jnp.zeros((pb, K_PAD), jnp.bfloat16)
    xp = xp.at[:batch, :in_features].set(x.astype(jnp.bfloat16))

    grid = (pb // tm,)

    flops = 2 * batch * (991 * 100 + 4 * 100 * 100 + 100 * 2)
    transcendentals = 5 * batch * 100
    bytes_accessed = ((w1p.size + whp.size + w6p.size) * 2 + bias.size * 4
                      + xp.size * 2 + pb * OUT_PAD * 4)
    cost = pl.CostEstimate(flops=flops, transcendentals=transcendentals,
                           bytes_accessed=bytes_accessed)

    out_padded = pl.pallas_call(
        drebin_mlp_kernel,
        out_shape=jax.ShapeDtypeStruct((pb, OUT_PAD), jnp.float32),
        grid_spec=pltpu.PrefetchScalarGridSpec(
            num_scalar_prefetch=0,
            grid=grid,
            in_specs=[
                pl.BlockSpec((tm, K_PAD), lambda i: (i, 0)),          # x tile (pipelined)
                pl.BlockSpec((K_PAD, H_PAD), lambda i: (0, 0)),       # w1 (resident)
                pl.BlockSpec((4, H_PAD, H_PAD), lambda i: (0, 0, 0)), # w2..w5 slab
                pl.BlockSpec((H_PAD, OUT_PAD), lambda i: (0, 0)),     # w6
                pl.BlockSpec((8, OUT_PAD), lambda i: (0, 0)),         # bias slab
            ],
            out_specs=pl.BlockSpec((tm, OUT_PAD), lambda i: (i, 0)),
        ),
        compiler_params=pltpu.CompilerParams(
            dimension_semantics=("parallel",)),
        cost_estimate=cost,
    )(xp, w1p, whp, w6p, bias)

    return out_padded[:batch, :out_features]


def init_params(key, input_size=991, fc1=100, fc2=100, fc3=100, fc4=100,
                fc5=100, out=2):
    """PyTorch-style Linear init: U(-1/sqrt(fan_in), 1/sqrt(fan_in)).
    W stored as (in, out) so forward is x @ W + b (== torch x @ W.T)."""
    dims = [input_size, fc1, fc2, fc3, fc4, fc5, out]
    params = []
    for i in range(len(dims) - 1):
        fan_in, fan_out = dims[i], dims[i + 1]
        key, kw, kb = jax.random.split(key, 3)
        bound = 1.0 / jnp.sqrt(jnp.float32(fan_in))
        w = jax.random.uniform(kw, (fan_in, fan_out), jnp.float32,
                               minval=-bound, maxval=bound)
        b = jax.random.uniform(kb, (fan_out,), jnp.float32,
                               minval=-bound, maxval=bound)
        params.append((w, b))
    return params


def reference_forward_matched(x, params):
    """Matched-precision reference: bf16 matmul inputs, f32 accumulation, f32 tanh."""
    h = x.astype(jnp.bfloat16)
    for w, b in params[:-1]:
        acc = jnp.dot(h, w.astype(jnp.bfloat16),
                      preferred_element_type=jnp.float32) + b
        h = jnp.tanh(acc).astype(jnp.bfloat16)
    w, b = params[-1]
    return jnp.dot(h, w.astype(jnp.bfloat16),
                   preferred_element_type=jnp.float32) + b


if __name__ == "__main__":
    key = jax.random.PRNGKey(0)
    key, kx = jax.random.split(key)

    batch = 8
    input_size = 991
    x = jax.random.normal(kx, (batch, input_size), jnp.float32)

    params = init_params(key, input_size=input_size)

    out = drebin_net5_forward(x, params)
    out = jax.block_until_ready(out)

    ref = reference_forward_matched(x, params)
    assert out.shape == (batch, 2), out.shape
    assert jnp.allclose(out, ref, atol=2e-2, rtol=2e-2), (
        float(jnp.max(jnp.abs(out - ref))))

    print("KERNEL_OK")
</pallas_src>

<mosaic_0001>
module attributes {stable_mosaic.version = 11 : i64} {
  func.func @drebin_mlp_kernel(%arg0: i32, %arg1: memref<8x1024xbf16, #tpu.memory_space<vmem>>, %arg2: memref<1024x128xbf16, #tpu.memory_space<vmem>>, %arg3: memref<4x128x128xbf16, #tpu.memory_space<vmem>>, %arg4: memref<128x128xbf16, #tpu.memory_space<vmem>>, %arg5: memref<8x128xf32, #tpu.memory_space<vmem>>, %arg6: memref<8x128xf32, #tpu.memory_space<vmem>>) attributes {dimension_semantics = [#tpu.dimension_semantics<parallel>], iteration_bounds = array<i64: 1>, scalar_prefetch = 0 : i64, scratch_operands = 0 : i64, tpu.core_type = #tpu.core_type<tc>, window_params = [{transform_indices = @transform_0, window_bounds = array<i64: 8, 1024>}, {pipeline_mode = #tpu.pipeline_mode<synchronous>, transform_indices = @transform_1, window_bounds = array<i64: 1024, 128>}, {pipeline_mode = #tpu.pipeline_mode<synchronous>, transform_indices = @transform_2, window_bounds = array<i64: 4, 128, 128>}, {pipeline_mode = #tpu.pipeline_mode<synchronous>, transform_indices = @transform_3, window_bounds = array<i64: 128, 128>}, {pipeline_mode = #tpu.pipeline_mode<synchronous>, transform_indices = @transform_4, window_bounds = array<i64: 8, 128>}, {transform_indices = @transform_5, window_bounds = array<i64: 8, 128>}]} {
    %c0 = arith.constant 0 : index
    %c0_0 = arith.constant 0 : index
    %0 = vector.load %arg1[%c0, %c0_0] : memref<8x1024xbf16, #tpu.memory_space<vmem>>, vector<8x1024xbf16>
    %c0_1 = arith.constant 0 : index
    %c0_2 = arith.constant 0 : index
    %1 = vector.load %arg2[%c0_1, %c0_2] : memref<1024x128xbf16, #tpu.memory_space<vmem>>, vector<1024x128xbf16>
    %c0_3 = arith.constant 0 : index
    %c0_4 = arith.constant 0 : index
    %2 = vector.load %arg5[%c0_3, %c0_4] : memref<8x128xf32, #tpu.memory_space<vmem>>, vector<1x128xf32>
    %cst = arith.constant dense<0.000000e+00> : vector<8x128xf32>
    %3 = tpu.matmul %0, %1, %cst {dimension_numbers = #tpu.dot_dimension_numbers<[1], [0], [0], [1], [0, 0, 1, 1], [], []>} : vector<8x1024xbf16>, vector<1024x128xbf16>, vector<8x128xf32> -> vector<8x128xf32>
    %4 = vector.broadcast %2 : vector<1x128xf32> to vector<8x128xf32>
    %5 = arith.addf %3, %4 : vector<8x128xf32>
    %6 = math.tanh %5 : vector<8x128xf32>
    %7 = arith.truncf %6 : vector<8x128xf32> to vector<8x128xbf16>
    %c0_5 = arith.constant 0 : index
    %c0_6 = arith.constant 0 : index
    %c0_7 = arith.constant 0 : index
    %8 = vector.load %arg3[%c0_5, %c0_6, %c0_7] : memref<4x128x128xbf16, #tpu.memory_space<vmem>>, vector<1x128x128xbf16>
    %9 = vector.shape_cast %8 : vector<1x128x128xbf16> to vector<128x128xbf16>
    %c1 = arith.constant 1 : index
    %c0_8 = arith.constant 0 : index
    %10 = vector.load %arg5[%c1, %c0_8] : memref<8x128xf32, #tpu.memory_space<vmem>>, vector<1x128xf32>
    %cst_9 = arith.constant dense<0.000000e+00> : vector<8x128xf32>
    %11 = tpu.matmul %7, %9, %cst_9 {dimension_numbers = #tpu.dot_dimension_numbers<[1], [0], [0], [1], [0, 0, 1, 1], [], []>} : vector<8x128xbf16>, vector<128x128xbf16>, vector<8x128xf32> -> vector<8x128xf32>
    %12 = vector.broadcast %10 : vector<1x128xf32> to vector<8x128xf32>
    %13 = arith.addf %11, %12 : vector<8x128xf32>
    %14 = math.tanh %13 : vector<8x128xf32>
    %15 = arith.truncf %14 : vector<8x128xf32> to vector<8x128xbf16>
    %c1_10 = arith.constant 1 : index
    %c0_11 = arith.constant 0 : index
    %c0_12 = arith.constant 0 : index
    %16 = vector.load %arg3[%c1_10, %c0_11, %c0_12] : memref<4x128x128xbf16, #tpu.memory_space<vmem>>, vector<1x128x128xbf16>
    %17 = vector.shape_cast %16 : vector<1x128x128xbf16> to vector<128x128xbf16>
    %c2 = arith.constant 2 : index
    %c0_13 = arith.constant 0 : index
    %18 = vector.load %arg5[%c2, %c0_13] : memref<8x128xf32, #tpu.memory_space<vmem>>, vector<1x128xf32>
    %cst_14 = arith.constant dense<0.000000e+00> : vector<8x128xf32>
    %19 = tpu.matmul %15, %17, %cst_14 {dimension_numbers = #tpu.dot_dimension_numbers<[1], [0], [0], [1], [0, 0, 1, 1], [], []>} : vector<8x128xbf16>, vector<128x128xbf16>, vector<8x128xf32> -> vector<8x128xf32>
    %20 = vector.broadcast %18 : vector<1x128xf32> to vector<8x128xf32>
    %21 = arith.addf %19, %20 : vector<8x128xf32>
    %22 = math.tanh %21 : vector<8x128xf32>
    %23 = arith.truncf %22 : vector<8x128xf32> to vector<8x128xbf16>
    %c2_15 = arith.constant 2 : index
    %c0_16 = arith.constant 0 : index
    %c0_17 = arith.constant 0 : index
    %24 = vector.load %arg3[%c2_15, %c0_16, %c0_17] : memref<4x128x128xbf16, #tpu.memory_space<vmem>>, vector<1x128x128xbf16>
    %25 = vector.shape_cast %24 : vector<1x128x128xbf16> to vector<128x128xbf16>
    %c3 = arith.constant 3 : index
    %c0_18 = arith.constant 0 : index
    %26 = vector.load %arg5[%c3, %c0_18] : memref<8x128xf32, #tpu.memory_space<vmem>>, vector<1x128xf32>
    %cst_19 = arith.constant dense<0.000000e+00> : vector<8x128xf32>
    %27 = tpu.matmul %23, %25, %cst_19 {dimension_numbers = #tpu.dot_dimension_numbers<[1], [0], [0], [1], [0, 0, 1, 1], [], []>} : vector<8x128xbf16>, vector<128x128xbf16>, vector<8x128xf32> -> vector<8x128xf32>
    %28 = vector.broadcast %26 : vector<1x128xf32> to vector<8x128xf32>
    %29 = arith.addf %27, %28 : vector<8x128xf32>
    %30 = math.tanh %29 : vector<8x128xf32>
    %31 = arith.truncf %30 : vector<8x128xf32> to vector<8x128xbf16>
    %c3_20 = arith.constant 3 : index
    %c0_21 = arith.constant 0 : index
    %c0_22 = arith.constant 0 : index
    %32 = vector.load %arg3[%c3_20, %c0_21, %c0_22] : memref<4x128x128xbf16, #tpu.memory_space<vmem>>, vector<1x128x128xbf16>
    %33 = vector.shape_cast %32 : vector<1x128x128xbf16> to vector<128x128xbf16>
    %c4 = arith.constant 4 : index
    %c0_23 = arith.constant 0 : index
    %34 = vector.load %arg5[%c4, %c0_23] : memref<8x128xf32, #tpu.memory_space<vmem>>, vector<1x128xf32>
    %cst_24 = arith.constant dense<0.000000e+00> : vector<8x128xf32>
    %35 = tpu.matmul %31, %33, %cst_24 {dimension_numbers = #tpu.dot_dimension_numbers<[1], [0], [0], [1], [0, 0, 1, 1], [], []>} : vector<8x128xbf16>, vector<128x128xbf16>, vector<8x128xf32> -> vector<8x128xf32>
    %36 = vector.broadcast %34 : vector<1x128xf32> to vector<8x128xf32>
    %37 = arith.addf %35, %36 : vector<8x128xf32>
    %38 = math.tanh %37 : vector<8x128xf32>
    %39 = arith.truncf %38 : vector<8x128xf32> to vector<8x128xbf16>
    %c0_25 = arith.constant 0 : index
    %c0_26 = arith.constant 0 : index
    %40 = vector.load %arg4[%c0_25, %c0_26] : memref<128x128xbf16, #tpu.memory_space<vmem>>, vector<128x128xbf16>
    %c5 = arith.constant 5 : index
    %c0_27 = arith.constant 0 : index
    %41 = vector.load %arg5[%c5, %c0_27] : memref<8x128xf32, #tpu.memory_space<vmem>>, vector<1x128xf32>
    %cst_28 = arith.constant dense<0.000000e+00> : vector<8x128xf32>
    %42 = tpu.matmul %39, %40, %cst_28 {dimension_numbers = #tpu.dot_dimension_numbers<[1], [0], [0], [1], [0, 0, 1, 1], [], []>} : vector<8x128xbf16>, vector<128x128xbf16>, vector<8x128xf32> -> vector<8x128xf32>
    %43 = vector.broadcast %41 : vector<1x128xf32> to vector<8x128xf32>
    %44 = arith.addf %42, %43 : vector<8x128xf32>
    %c0_29 = arith.constant 0 : index
    %c0_30 = arith.constant 0 : index
    %45 = vector.load %arg6[%c0_29, %c0_30] : memref<8x128xf32, #tpu.memory_space<vmem>>, vector<8x128xf32>
    tpu.vector_store %arg6[%c0_29, %c0_30], %44 {strides = array<i32>} : memref<8x128xf32, #tpu.memory_space<vmem>>, vector<8x128xf32>,
    return
  }
  func.func @transform_0(%arg0: i32) -> (i32, i32) {
    %c0_i32 = arith.constant 0 : i32
    %c0_i32_0 = arith.constant 0 : i32
    return %arg0, %c0_i32 : i32, i32
  }
  func.func @transform_1(%arg0: i32) -> (i32, i32) {
    %c0_i32 = arith.constant 0 : i32
    %c0_i32_0 = arith.constant 0 : i32
    %c0_i32_1 = arith.constant 0 : i32
    return %c0_i32, %c0_i32_0 : i32, i32
  }
  func.func @transform_2(%arg0: i32) -> (i32, i32, i32) {
    %c0_i32 = arith.constant 0 : i32
    %c0_i32_0 = arith.constant 0 : i32
    %c0_i32_1 = arith.constant 0 : i32
    %c0_i32_2 = arith.constant 0 : i32
    return %c0_i32, %c0_i32_0, %c0_i32_1 : i32, i32, i32
  }
  func.func @transform_3(%arg0: i32) -> (i32, i32) {
    %c0_i32 = arith.constant 0 : i32
    %c0_i32_0 = arith.constant 0 : i32
    %c0_i32_1 = arith.constant 0 : i32
    return %c0_i32, %c0_i32_0 : i32, i32
  }
  func.func @transform_4(%arg0: i32) -> (i32, i32) {
    %c0_i32 = arith.constant 0 : i32
    %c0_i32_0 = arith.constant 0 : i32
    %c0_i32_1 = arith.constant 0 : i32
    return %c0_i32, %c0_i32_0 : i32, i32
  }
  func.func @transform_5(%arg0: i32) -> (i32, i32) {
    %c0_i32 = arith.constant 0 : i32
    %c0_i32_0 = arith.constant 0 : i32
    return %arg0, %c0_i32 : i32, i32
  }
}

</mosaic_0001>

<bundles_post_ra>
// kernel: tpu_custom_call.1
= control target key start
LH: loop header
LB: loop body
LE: loop exit
PB: predicated region body
PF: predicated region fallthrough
CT: control target
= control target key end

     0   :  { %10 = vsyncpa [#allocation3], 0  ;;  %s2136_s0 = inlined_call_operand.hbm [shape: bf16[8,1024], index: 0, kind: input, shape index: {}]   ;;  %s2137_s1 = inlined_call_operand.hbm [shape: bf16[1024,128], index: 1, kind: input, shape index: {}]   ;;  %s2138_s2 = inlined_call_operand.hbm [shape: bf16[4,128,128], index: 2, kind: input, shape index: {}]   ;;  %s2139_s3 = inlined_call_operand.hbm [shape: bf16[128,128], index: 3, kind: input, shape index: {}]   ;;  %s2140_s4 = inlined_call_operand.vmem [shape: f32[8,128], index: 4, kind: input, shape index: {}]   ;;  %s2141_s5 = inlined_call_operand.hbm [shape: f32[8,128], index: 5, kind: output, shape index: {}]  }
   0x1   :  { %11 = vsyncpa [#allocation6], 0 }
   0x2   :  { %12 = vsyncpa [#allocation9], 0 }
   0x3   :  { %13 = vsyncpa [#allocation4], 0  ;;  %s1960_s18 = smov [#allocation5]   ;;  %s1842_s22 = scalar_lea.hbm %s2137_s1, 8192 }
   0x4   :  { %s29_s19 = sshll.u32 %s1960_s18, 4  ;;  %p1843_p0 = scmp.ne.s32.totalorder %s2137_s1, %s1842_s22  ;;  %s30_s19 = int_to_ptr.vmem [resolvable:$true] %s29_s19 }
   0x5   :  { %p1846_p1 = scmp.lt.u32.totalorder %s1842_s22, %s2137_s1 }
   0x7   :  { %p1848_p2 = pnand %p1846_p1, %p1843_p0 }
   0x9   :  { %1851 = shalt.err (!%p1848_p2)
}
   0xa   :  { %s1852_s27 = scalar_lea.vmem %s30_s19, 8192  ;;  %p1857_p4 = scmp.lt.s32.totalorder %s30_s19, %s30_s19 }
   0xb   :  { %p1853_p3 = scmp.ne.s32.totalorder %s30_s19, %s1852_s27  ;;  %p1858_p5 = scmp.lt.s32.totalorder %s1852_s27, %s1852_s27 }
   0xd   :  { %p1859_p6 = por %p1858_p5, %p1857_p4 }
   0xf   :  { %p1860_p7 = pnand %p1859_p6, %p1853_p3 }
  0x11   :  { %1863 = shalt.err (!%p1860_p7)
}
  0x12   :  { %s1961_s28 = smov 64   ;;  %s1962_s29 = smov 4  }
  0x13   :  { %35 = dma.hbm_to_vmem [thread:$0]  %s2137_s1, 8192, %s30_s19, [#allocation6], %s1961_s28, %s1961_s28, %s1962_s29  }
  0x14   :  { %s1963_s7 = smov [#allocation2]   ;;  %s1964_s9 = smov [#allocation7]  }
  0x15   :  { %s20_s8 = sshll.u32 %s1963_s7, 4  ;;  %s41_s10 = sshll.u32 %s1964_s9, 4  ;;  %s21_s8 = int_to_ptr.vmem [resolvable:$true] %s20_s8  ;;  %s42_s10 = int_to_ptr.vmem [resolvable:$true] %s41_s10 }
  0x16   :  { %s1864_s13 = scalar_lea.hbm %s2136_s0, 512 }
  0x17   :  { %p1865_p8 = scmp.ne.s32.totalorder %s2136_s0, %s1864_s13  ;;  %p1868_p9 = scmp.lt.u32.totalorder %s1864_s13, %s2136_s0 }
  0x19   :  { %p1870_p10 = pnand %p1868_p9, %p1865_p8 }
  0x1b   :  { %1873 = shalt.err (!%p1870_p10)
}
  0x1c   :  { %s1874_s1 = scalar_lea.vmem %s21_s8, 512  ;;  %p1879_p12 = scmp.lt.s32.totalorder %s21_s8, %s21_s8 }
  0x1d   :  { %p1875_p11 = scmp.ne.s32.totalorder %s21_s8, %s1874_s1  ;;  %p1880_p13 = scmp.lt.s32.totalorder %s1874_s1, %s1874_s1 }
  0x1f   :  { %p1881_p0 = por %p1880_p13, %p1879_p12 }
  0x21   :  { %p1882_p1 = pnand %p1881_p0, %p1875_p11 }
  0x23   :  { %1885 = shalt.err (!%p1882_p1)
}
  0x24   :  { %23 = dma.hbm_to_vmem [thread:$0]  %s2136_s0, 512, %s21_s8, [#allocation3]  }
  0x25   :  { %s1886_s22 = scalar_lea.hbm %s2138_s2, 4096 }
  0x26   :  { %p1887_p2 = scmp.ne.s32.totalorder %s2138_s2, %s1886_s22  ;;  %p1890_p3 = scmp.lt.u32.totalorder %s1886_s22, %s2138_s2 }
  0x28   :  { %p1892_p4 = pnand %p1890_p3, %p1887_p2 }
  0x2a   :  { %1895 = shalt.err (!%p1892_p4)
}
  0x2b   :  { %s1896_s27 = scalar_lea.vmem %s42_s10, 4096  ;;  %p1901_p6 = scmp.lt.s32.totalorder %s42_s10, %s42_s10 }
  0x2c   :  { %p1897_p5 = scmp.ne.s32.totalorder %s42_s10, %s1896_s27  ;;  %p1902_p7 = scmp.lt.s32.totalorder %s1896_s27, %s1896_s27 }
  0x2e   :  { %p1903_p8 = por %p1902_p7, %p1901_p6 }
  0x30   :  { %p1904_p9 = pnand %p1903_p8, %p1897_p5 }
  0x32   :  { %1907 = shalt.err (!%p1904_p9)
}
  0x33   :  { %47 = dma.hbm_to_vmem [thread:$0]  %s2138_s2, 4096, %s42_s10, [#allocation6], %s1961_s28, %s1961_s28, %s1962_s29  }
  0x34   :  { %s1965_s6 = smov [#allocation8]   ;;  %s1908_s11 = scalar_lea.hbm %s2139_s3, 1024 }
  0x35   :  { %s53_s7 = sshll.u32 %s1965_s6, 4  ;;  %p1909_p10 = scmp.ne.s32.totalorder %s2139_s3, %s1908_s11  ;;  %s54_s7 = int_to_ptr.vmem [resolvable:$true] %s53_s7 }
  0x36   :  { %p1912_p11 = scmp.lt.u32.totalorder %s1908_s11, %s2139_s3 }
  0x38   :  { %p1914_p12 = pnand %p1912_p11, %p1909_p10 }
  0x3a   :  { %1917 = shalt.err (!%p1914_p12)
}
  0x3b   :  { %s1918_s16 = scalar_lea.vmem %s54_s7, 1024  ;;  %p1923_p0 = scmp.lt.s32.totalorder %s54_s7, %s54_s7 }
  0x3c   :  { %p1919_p13 = scmp.ne.s32.totalorder %s54_s7, %s1918_s16  ;;  %p1924_p1 = scmp.lt.s32.totalorder %s1918_s16, %s1918_s16 }
  0x3e   :  { %p1925_p2 = por %p1924_p1, %p1923_p0 }
  0x40   :  { %p1926_p3 = pnand %p1925_p2, %p1919_p13 }
  0x42   :  { %1929 = shalt.err (!%p1926_p3)
}
  0x43   :  { %59 = dma.hbm_to_vmem [thread:$0]  %s2139_s3, 1024, %s54_s7, [#allocation9], %s1961_s28, %s1961_s28, %s1962_s29  }
  0x44   :  { %1952 = dma.done.wait [#allocation3], 512  }
  0x45   :  { %1953 = vsyncadd [#allocation3], 4294966784 }
  0x46   :  { %1954 = dma.done.wait [#allocation6], 12288  }
  0x47   :  { %1955 = vsyncadd [#allocation6], 4294955008 }
  0x48   :  { %1956 = dma.done.wait [#allocation9], 1024  }
  0x49   :  { %1957 = vsyncadd [#allocation9], 4294966272  ;;  %v1720_v0 = vld [vmem:[#allocation5 + $0x40] sm:$0xff]   ;;  %v1724_v4 = vld [vmem:[#allocation5 + $0x48] sm:$0xff]   ;;  %vm1967_vm0 = vmmov 0   ;;  %s1968_s25 = smov [#allocation10]  }
  0x4a   :  { %v1721_v1 = vld [vmem:[#allocation5 + $0xc0] sm:$0xff]   ;;  %1478 = vmatprep.subr.bf16.mxu0 %v1720_v0  ;;  %v1725_v5 = vld [vmem:[#allocation5 + $0xc8] sm:$0xff]   ;;  %v1728_v8 = vld [vmem:[#allocation5 + $0x50] sm:$0xff]   ;;  %s1349_s26 = sshll.u32 %s1968_s25, 4  ;;  %s1350_s26 = int_to_ptr.vmem [resolvable:$true] %s1349_s26 }
  0x4b   :  { %v1722_v2 = vld [vmem:[#allocation5] sm:$0xff]   ;;  %1500 = vmatprep.subr.bf16.mxu1 %v1721_v1  ;;  %v1726_v6 = vld [vmem:[#allocation5 + $0x8] sm:$0xff]   ;;  %v1729_v9 = vld [vmem:[#allocation5 + $0xd0] sm:$0xff]   ;;  %s1930_s27 = scalar_lea.vmem %s1350_s26, 128  ;;  %p1935_p5 = scmp.lt.s32.totalorder %s1350_s26, %s1350_s26 }
  0x4c   :  { %v1723_v3 = vld [vmem:[#allocation5 + $0x80] sm:$0xff]   ;;  %1479 = vmatpush3.bf16.msra.mxu0 %v1722_v2  ;;  %v1727_v7 = vld [vmem:[#allocation5 + $0x88] sm:$0xff]   ;;  %v1730_v10 = vld [vmem:[#allocation5 + $0x10] sm:$0xff]   ;;  %p1931_p4 = scmp.ne.s32.totalorder %s1350_s26, %s1930_s27  ;;  %p1936_p6 = scmp.lt.s32.totalorder %s1930_s27, %s1930_s27 }
  0x4d   :  { %1501 = vmatpush3.bf16.msra.mxu1 %v1723_v3  ;;  %1480 = vmatprep.subr.bf16.mxu0 %v1724_v4  ;;  %v1731_v11 = vld [vmem:[#allocation5 + $0x90] sm:$0xff]   ;;  %v1732_v12 = vld [vmem:[#allocation5 + $0x58] sm:$0xff]   ;;  %v1736_v16 = vld [vmem:[#allocation5 + $0x60] sm:$0xff]  }
  0x4e   :  { %1502 = vmatprep.subr.bf16.mxu1 %v1725_v5  ;;  %v1733_v13 = vld [vmem:[#allocation5 + $0xd8] sm:$0xff]   ;;  %v1737_v17 = vld [vmem:[#allocation5 + $0xe0] sm:$0xff]   ;;  %v1740_v20 = vld [vmem:[#allocation5 + $0x68] sm:$0xff]   ;;  %p1937_p7 = por %p1936_p6, %p1935_p5 }
  0x4f   :  { %v1734_v14 = vld [vmem:[#allocation5 + $0x18] sm:$0xff]   ;;  %v1738_v18 = vld [vmem:[#allocation5 + $0x20] sm:$0xff]   ;;  %v1741_v21 = vld [vmem:[#allocation5 + $0xe8] sm:$0xff]  }
  0x50   :  { %1481 = vmatpush3.bf16.msra.mxu0 %v1726_v6  ;;  %v1735_v15 = vld [vmem:[#allocation5 + $0x98] sm:$0xff]   ;;  %v1739_v19 = vld [vmem:[#allocation5 + $0xa0] sm:$0xff]   ;;  %v1742_v22 = vld [vmem:[#allocation5 + $0x28] sm:$0xff]   ;;  %p1938_p8 = pnand %p1937_p7, %p1931_p4 }
  0x51   :  { %1503 = vmatpush3.bf16.msra.mxu1 %v1727_v7  ;;  %1482 = vmatprep.subr.bf16.mxu0 %v1728_v8  ;;  %v1743_v23 = vld [vmem:[#allocation5 + $0xa8] sm:$0xff]   ;;  %v1744_v24 = vld [vmem:[#allocation5 + $0x70] sm:$0xff]   ;;  %v1748_v28 = vld [vmem:[#allocation5 + $0x78] sm:$0xff]  }
  0x52   :  { %1504 = vmatprep.subr.bf16.mxu1 %v1729_v9  ;;  %v1745_v25 = vld [vmem:[#allocation5 + $0xf0] sm:$0xff]   ;;  %v1749_v29 = vld [vmem:[#allocation5 + $0xf8] sm:$0xff]   ;;  %v75_v32 = vld [vmem:[#allocation2] sm:$0xff] }
  0x53   :  { %v1746_v26 = vld [vmem:[#allocation5 + $0x30] sm:$0xff]   ;;  %v1750_v30 = vld [vmem:[#allocation5 + $0x38] sm:$0xff]   ;;  %v76_v33 = vld [vmem:[#allocation2 + $0x8] sm:$0xff]  ;;  %v1361_v34 = vcombine.low %v75_v32, %v75_v32  ;;  %v1362_v35 = vcombine.high %v75_v32, %v75_v32 }
  0x54   :  { %1483 = vmatpush3.bf16.msra.mxu0 %v1730_v10  ;;  %v1747_v27 = vld [vmem:[#allocation5 + $0xb0] sm:$0xff]   ;;  %v1751_v31 = vld [vmem:[#allocation5 + $0xb8] sm:$0xff]   ;;  %v1363_v36 = vcombine.low %v76_v33, %v76_v33  ;;  %v1364_v37 = vcombine.high %v76_v33, %v76_v33  ;;  %v1756_v38 = vld [vmem:[#allocation5 + $0x140] sm:$0xff]  }
  0x55   :  { %1505 = vmatpush3.bf16.msra.mxu1 %v1731_v11  ;;  %1484 = vmatprep.subr.bf16.mxu0 %v1732_v12  ;;  %v1757_v39 = vld [vmem:[#allocation5 + $0x1c0] sm:$0xff]   ;;  %v1760_v42 = vld [vmem:[#allocation5 + $0x148] sm:$0xff]   ;;  %v1764_v46 = vld [vmem:[#allocation5 + $0x150] sm:$0xff]  }
  0x56   :  { %1506 = vmatprep.subr.bf16.mxu1 %v1733_v13  ;;  %656 = vmatprep.mubr.bf16.mxu0 %v1362_v35  ;;  %v1758_v40 = vld [vmem:[#allocation5 + $0x100] sm:$0xff]   ;;  %v1761_v43 = vld [vmem:[#allocation5 + $0x1c8] sm:$0xff]   ;;  %v1765_v47 = vld [vmem:[#allocation5 + $0x1d0] sm:$0xff]   ;;  %v1966_v13 = vmov 0.0  }
  0x57   :  { %696 = vmatprep.mubr.bf16.mxu1 %v1364_v37  ;;  %v1759_v41 = vld [vmem:[#allocation5 + $0x180] sm:$0xff]   ;;  %v1762_v44 = vld [vmem:[#allocation5 + $0x108] sm:$0xff]   ;;  %v1766_v48 = vld [vmem:[#allocation5 + $0x110] sm:$0xff]  }
  0x58   :  { %1485 = vmatpush3.bf16.msra.mxu0 %v1734_v14  ;;  %v1763_v45 = vld [vmem:[#allocation5 + $0x188] sm:$0xff]   ;;  %v1767_v49 = vld [vmem:[#allocation5 + $0x190] sm:$0xff]   ;;  %v1768_v50 = vld [vmem:[#allocation5 + $0x158] sm:$0xff]  }
  0x59   :  { %1507 = vmatpush3.bf16.msra.mxu1 %v1735_v15  ;;  %1486 = vmatprep.subr.bf16.mxu0 %v1736_v16  ;;  %v1769_v51 = vld [vmem:[#allocation5 + $0x1d8] sm:$0xff]   ;;  %v1772_v54 = vld [vmem:[#allocation5 + $0x160] sm:$0xff]   ;;  %v1776_v58 = vld [vmem:[#allocation5 + $0x168] sm:$0xff]  }
  0x5a   :  { %1508 = vmatprep.subr.bf16.mxu1 %v1737_v17  ;;  %v1770_v52 = vld [vmem:[#allocation5 + $0x118] sm:$0xff]   ;;  %v1773_v55 = vld [vmem:[#allocation5 + $0x1e0] sm:$0xff]   ;;  %v1777_v59 = vld [vmem:[#allocation5 + $0x1e8] sm:$0xff]  }
  0x5b   :  { %v1771_v53 = vld [vmem:[#allocation5 + $0x198] sm:$0xff]   ;;  %v1774_v56 = vld [vmem:[#allocation5 + $0x120] sm:$0xff]   ;;  %v1778_v60 = vld [vmem:[#allocation5 + $0x128] sm:$0xff]  }
  0x5c   :  { %1487 = vmatpush3.bf16.msra.mxu0 %v1738_v18  ;;  %v1775_v57 = vld [vmem:[#allocation5 + $0x1a0] sm:$0xff]   ;;  %v1779_v61 = vld [vmem:[#allocation5 + $0x1a8] sm:$0xff]   ;;  %v1780_v62 = vld [vmem:[#allocation5 + $0x170] sm:$0xff]  }
  0x5d   :  { %1509 = vmatpush3.bf16.msra.mxu1 %v1739_v19  ;;  %1488 = vmatprep.subr.bf16.mxu0 %v1740_v20  ;;  %v1781_v63 = vld [vmem:[#allocation5 + $0x1f0] sm:$0xff]   ;;  %v1784_v2 = vld [vmem:[#allocation5 + $0x178] sm:$0xff]   ;;  %v1792_v12 = vld [vmem:[#allocation7] sm:$0xff]  }
  0x5e   :  { %1510 = vmatprep.subr.bf16.mxu1 %v1741_v21  ;;  %v1782_v0 = vld [vmem:[#allocation5 + $0x130] sm:$0xff]   ;;  %v1785_v3 = vld [vmem:[#allocation5 + $0x1f8] sm:$0xff]   ;;  %v1793_v14 = vld [vmem:[#allocation7 + $0x8] sm:$0xff]  }
  0x5f   :  { %v1783_v1 = vld [vmem:[#allocation5 + $0x1b0] sm:$0xff]   ;;  %v1786_v4 = vld [vmem:[#allocation5 + $0x138] sm:$0xff]   ;;  %v1796_v17 = vld [vmem:[#allocation7 + $0x20] sm:$0xff]  }
  0x60   :  { %1489 = vmatpush3.bf16.msra.mxu0 %v1742_v22  ;;  %v1787_v5 = vld [vmem:[#allocation5 + $0x1b8] sm:$0xff]   ;;  %v77_v6 = vld [vmem:[#allocation2 + $0x10] sm:$0xff]  ;;  %v1797_v18 = vld [vmem:[#allocation7 + $0x28] sm:$0xff]  }
  0x61   :  { %1511 = vmatpush3.bf16.msra.mxu1 %v1743_v23  ;;  %1490 = vmatprep.subr.bf16.mxu0 %v1744_v24  ;;  %v1365_v7 = vcombine.low %v77_v6, %v77_v6  ;;  %v1366_v8 = vcombine.high %v77_v6, %v77_v6  ;;  %v78_v9 = vld [vmem:[#allocation2 + $0x18] sm:$0xff]  ;;  %v1794_v15 = vld [vmem:[#allocation7 + $0x10] sm:$0xff]   ;;  %v1800_v21 = vld [vmem:[#allocation7 + $0x40] sm:$0xff]  }
  0x62   :  { %1512 = vmatprep.subr.bf16.mxu1 %v1745_v25  ;;  %v1367_v10 = vcombine.low %v78_v9, %v78_v9  ;;  %v1368_v11 = vcombine.high %v78_v9, %v78_v9  ;;  %v1795_v16 = vld [vmem:[#allocation7 + $0x18] sm:$0xff]   ;;  %v1798_v19 = vld [vmem:[#allocation7 + $0x30] sm:$0xff]   ;;  %v1801_v22 = vld [vmem:[#allocation7 + $0x48] sm:$0xff]  }
  0x63   :  { %v1799_v20 = vld [vmem:[#allocation7 + $0x38] sm:$0xff]   ;;  %v1802_v23 = vld [vmem:[#allocation7 + $0x50] sm:$0xff]   ;;  %v1817_v9 = vld [vmem:[#allocation7 + $0xc8] sm:$0xff]  }
  0x64   :  { %1491 = vmatpush3.bf16.msra.mxu0 %v1746_v26  ;;  %v1803_v24 = vld [vmem:[#allocation7 + $0x58] sm:$0xff]   ;;  %v1814_v6 = vld [vmem:[#allocation7 + $0xb0] sm:$0xff]  }
  0x65   :  { %1513 = vmatpush3.bf16.msra.mxu1 %v1747_v27  ;;  %1492 = vmatprep.subr.bf16.mxu0 %v1748_v28  ;;  %v1360_v27 = vld [vmem:[%s2140_s4] ss:$0 sm:$0xff] }
  0x66   :  { %1514 = vmatprep.subr.bf16.mxu1 %v1749_v29 }
  0x68   :  { %1493 = vmatpush3.bf16.msra.mxu0 %v1750_v30 }
  0x69   :  { %1515 = vmatpush3.bf16.msra.mxu1 %v1751_v31  ;;  %1522 = vmatprep.subr.bf16.mxu0 %v1756_v38 }
  0x6a   :  { %1544 = vmatprep.subr.bf16.mxu1 %v1757_v39 }
  0x6b   :  { %657 = vmatmul.mubr.bf16.vlgmr.msra.gmra.mrb[0].mxu0 %v1361_v34 }
  0x6c   :  { %697 = vmatmul.mubr.bf16.vlgmr.msra.gmra.mrb[0].mxu1 %v1363_v36  ;;  %1523 = vmatpush3.bf16.msra.mxu0 %v1758_v40 }
  0x6d   :  { %1545 = vmatpush3.bf16.msra.mxu1 %v1759_v41  ;;  %1524 = vmatprep.subr.bf16.mxu0 %v1760_v42 }
  0x6e   :  { %1546 = vmatprep.subr.bf16.mxu1 %v1761_v43  ;;  %736 = vmatprep.mubr.bf16.mxu0 %v1366_v8  ;;  %v1816_v8 = vld [vmem:[#allocation7 + $0xc0] sm:$0xff]  }
  0x6f   :  { %776 = vmatprep.mubr.bf16.mxu1 %v1368_v11  ;;  %v1819_v11 = vld [vmem:[#allocation7 + $0xd8] sm:$0xff]  }
  0x70   :  { %1525 = vmatpush3.bf16.msra.mxu0 %v1762_v44 }
  0x71   :  { %1547 = vmatpush3.bf16.msra.mxu1 %v1763_v45  ;;  %1526 = vmatprep.subr.bf16.mxu0 %v1764_v46 }
  0x72   :  { %1548 = vmatprep.subr.bf16.mxu1 %v1765_v47 }
  0x74   :  { %1527 = vmatpush3.bf16.msra.mxu0 %v1766_v48 }
  0x75   :  { %1549 = vmatpush3.bf16.msra.mxu1 %v1767_v49  ;;  %1528 = vmatprep.subr.bf16.mxu0 %v1768_v50 }
  0x76   :  { %1550 = vmatprep.subr.bf16.mxu1 %v1769_v51 }
  0x78   :  { %1529 = vmatpush3.bf16.msra.mxu0 %v1770_v52  ;;  %v1804_v52 = vld [vmem:[#allocation7 + $0x60] sm:$0xff]  }
  0x79   :  { %1551 = vmatpush3.bf16.msra.mxu1 %v1771_v53  ;;  %1530 = vmatprep.subr.bf16.mxu0 %v1772_v54  ;;  %v1805_v53 = vld [vmem:[#allocation7 + $0x68] sm:$0xff]   ;;  %v1806_v54 = vld [vmem:[#allocation7 + $0x70] sm:$0xff]  }
  0x7a   :  { %1552 = vmatprep.subr.bf16.mxu1 %v1773_v55  ;;  %v1807_v55 = vld [vmem:[#allocation7 + $0x78] sm:$0xff]  }
  0x7c   :  { %1531 = vmatpush3.bf16.msra.mxu0 %v1774_v56  ;;  %v1808_v56 = vld [vmem:[#allocation7 + $0x80] sm:$0xff]  }
  0x7d   :  { %1553 = vmatpush3.bf16.msra.mxu1 %v1775_v57  ;;  %1532 = vmatprep.subr.bf16.mxu0 %v1776_v58  ;;  %v1809_v57 = vld [vmem:[#allocation7 + $0x88] sm:$0xff]   ;;  %v1810_v58 = vld [vmem:[#allocation7 + $0x90] sm:$0xff]  }
  0x7e   :  { %1554 = vmatprep.subr.bf16.mxu1 %v1777_v59  ;;  %v1811_v59 = vld [vmem:[#allocation7 + $0x98] sm:$0xff]  }
  0x80   :  { %1533 = vmatpush3.bf16.msra.mxu0 %v1778_v60  ;;  %v1433_v60 = vld [vmem:[%s2140_s4 + $0x1] ss:$0 sm:$0xff] }
  0x81   :  { %1555 = vmatpush3.bf16.msra.mxu1 %v1779_v61  ;;  %1534 = vmatprep.subr.bf16.mxu0 %v1780_v62 }
  0x82   :  { %1556 = vmatprep.subr.bf16.mxu1 %v1781_v63 }
  0x84   :  { %1535 = vmatpush3.bf16.msra.mxu0 %v1782_v0 }
  0x85   :  { %1557 = vmatpush3.bf16.msra.mxu1 %v1783_v1  ;;  %1536 = vmatprep.subr.bf16.mxu0 %v1784_v2 }
  0x86   :  { %1558 = vmatprep.subr.bf16.mxu1 %v1785_v3 }
  0x88   :  { %1537 = vmatpush3.bf16.msra.mxu0 %v1786_v4  ;;  %v1812_v4 = vld [vmem:[#allocation7 + $0xa0] sm:$0xff]  }
  0x89   :  { %1559 = vmatpush3.bf16.msra.mxu1 %v1787_v5  ;;  %1611 = vmatprep.subr.bf16.mxu0 %v1966_v13  ;;  %v1813_v5 = vld [vmem:[#allocation7 + $0xa8] sm:$0xff]  }
  0x8a   :  { %1631 = vmatprep.subr.bf16.mxu1 %v1966_v13 }
  0x8b   :  { %737 = vmatmul.mubr.bf16.vlgmr.msra.gmra.mrb[4].mxu0 %v1365_v7  ;;  %v1815_v7 = vld [vmem:[#allocation7 + $0xb8] sm:$0xff]  }
  0x8c   :  { %777 = vmatmul.mubr.bf16.vlgmr.msra.gmra.mrb[4].mxu1 %v1367_v10  ;;  %1612 = vmatpush3.bf16.msra.mxu0 %v1792_v12  ;;  %v1818_v10 = vld [vmem:[#allocation7 + $0xd0] sm:$0xff]   ;;  %v1442_v12 = vld [vmem:[%s2140_s4 + $0x2] ss:$0 sm:$0xff] }
  0x8d   :  { %1613 = vmatprep.subr.bf16.mxu0 %v1966_v13  ;;  %1627 = vmatprep.mubr.msk.bf16.mxu0 %vm1967_vm0, %v1966_v13 }
  0x8e   :  { %1647 = vmatprep.mubr.msk.bf16.mxu1 %vm1967_vm0, %v1966_v13  ;;  %1632 = vmatpush3.bf16.msra.mxu1 %v1800_v21  ;;  %v1820_v21 = vld [vmem:[#allocation7 + $0xe0] sm:$0xff]  }
  0x8f   :  { %1633 = vmatprep.subr.bf16.mxu1 %v1966_v13 }
  0x90   :  { %1614 = vmatpush3.bf16.msra.mxu0 %v1793_v14 }
  0x91   :  { %1615 = vmatprep.subr.bf16.mxu0 %v1966_v13 }
  0x92   :  { %1634 = vmatpush3.bf16.msra.mxu1 %v1801_v22  ;;  %v1821_v22 = vld [vmem:[#allocation7 + $0xe8] sm:$0xff]  }
  0x93   :  { %1635 = vmatprep.subr.bf16.mxu1 %v1966_v13 }
  0x94   :  { %1616 = vmatpush3.bf16.msra.mxu0 %v1794_v15 }
  0x95   :  { %1617 = vmatprep.subr.bf16.mxu0 %v1966_v13 }
  0x96   :  { %1636 = vmatpush3.bf16.msra.mxu1 %v1802_v23  ;;  %v1822_v23 = vld [vmem:[#allocation7 + $0xf0] sm:$0xff]  }
  0x97   :  { %1637 = vmatprep.subr.bf16.mxu1 %v1966_v13 }
  0x98   :  { %1618 = vmatpush3.bf16.msra.mxu0 %v1795_v16 }
  0x99   :  { %1619 = vmatprep.subr.bf16.mxu0 %v1966_v13 }
  0x9a   :  { %1638 = vmatpush3.bf16.msra.mxu1 %v1803_v24  ;;  %v1823_v24 = vld [vmem:[#allocation7 + $0xf8] sm:$0xff]  }
  0x9b   :  { %1639 = vmatprep.subr.bf16.mxu1 %v1966_v13 }
  0x9c   :  { %1620 = vmatpush3.bf16.msra.mxu0 %v1796_v17 }
  0x9d   :  { %1621 = vmatprep.subr.bf16.mxu0 %v1966_v13 }
  0x9e   :  { %1640 = vmatpush3.bf16.msra.mxu1 %v1804_v52 }
  0x9f   :  { %1641 = vmatprep.subr.bf16.mxu1 %v1966_v13 }
  0xa0   :  { %1622 = vmatpush3.bf16.msra.mxu0 %v1797_v18 }
  0xa1   :  { %1623 = vmatprep.subr.bf16.mxu0 %v1966_v13 }
  0xa2   :  { %1642 = vmatpush3.bf16.msra.mxu1 %v1805_v53 }
  0xa3   :  { %1643 = vmatprep.subr.bf16.mxu1 %v1966_v13 }
  0xa4   :  { %1624 = vmatpush3.bf16.msra.mxu0 %v1798_v19 }
  0xa5   :  { %1625 = vmatprep.subr.bf16.mxu0 %v1966_v13 }
  0xa6   :  { %1644 = vmatpush3.bf16.msra.mxu1 %v1806_v54 }
  0xa7   :  { %1645 = vmatprep.subr.bf16.mxu1 %v1966_v13 }
  0xa8   :  { %1626 = vmatpush3.bf16.msra.mxu0 %v1799_v20 }
  0xa9   :  { %1651 = vmatprep.subr.bf16.mxu0 %v1966_v13 }
  0xaa   :  { %1646 = vmatpush3.bf16.msra.mxu1 %v1807_v55 }
  0xab   :  { %1671 = vmatprep.subr.bf16.mxu1 %v1966_v13 }
 0x13e   :  { %v1494_v25 = vpop.f32.mrb[0].mxu0 }
 0x13f   :  { %v1516_v26 = vpop.f32.mrb[0].mxu1  ;;  %v1495_v28 = vpop.f32.mrb[1].mxu0 }
 0x140   :  { %v1517_v29 = vpop.f32.mrb[1].mxu1  ;;  %v1496_v30 = vadd.f32 %v1495_v28, %v1494_v25  ;;  %v1497_v32 = vpop.f32.mrb[2].mxu0  ;;  %v1824_v25 = vld [vmem:[#allocation8] sm:$0xff]   ;;  %v1827_v28 = vld [vmem:[#allocation8 + $0x18] sm:$0xff]  }
 0x141   :  { %v1518_v31 = vadd.f32 %v1517_v29, %v1516_v26  ;;  %v1519_v33 = vpop.f32.mrb[2].mxu1  ;;  %v1498_v34 = vpop.f32.mrb[3].mxu0  ;;  %v1825_v26 = vld [vmem:[#allocation8 + $0x8] sm:$0xff]   ;;  %v1451_v29 = vld [vmem:[%s2140_s4 + $0x3] ss:$0 sm:$0xff] }
 0x142   :  { %v1520_v35 = vpop.f32.mrb[3].mxu1  ;;  %v659_v36 = vadd.f32 %v1496_v30, %v1360_v27  ;;  %v1826_v27 = vld [vmem:[#allocation8 + $0x10] sm:$0xff]  }
 0x144   :  { %v699_v37 = vadd.f32 %v1518_v31, %v659_v36 }
 0x15e   :  { %v1538_v38 = vpop.f32.mrb[4].mxu0 }
 0x15f   :  { %v1560_v39 = vpop.f32.mrb[4].mxu1  ;;  %v1539_v40 = vpop.f32.mrb[5].mxu0 }
 0x160   :  { %v1561_v41 = vpop.f32.mrb[5].mxu1  ;;  %v1540_v42 = vadd.f32 %v1539_v40, %v1538_v38  ;;  %v1541_v44 = vpop.f32.mrb[6].mxu0  ;;  %v1829_v38 = vld [vmem:[#allocation8 + $0x28] sm:$0xff]   ;;  %v1831_v40 = vld [vmem:[#allocation8 + $0x38] sm:$0xff]  }
 0x161   :  { %v1562_v43 = vadd.f32 %v1561_v41, %v1560_v39  ;;  %v1563_v45 = vpop.f32.mrb[6].mxu1  ;;  %v1542_v46 = vpop.f32.mrb[7].mxu0  ;;  %v1830_v39 = vld [vmem:[#allocation8 + $0x30] sm:$0xff]   ;;  %v1460_v41 = vld [vmem:[%s2140_s4 + $0x4] ss:$0 sm:$0xff] }
 0x162   :  { %v1564_v47 = vpop.f32.mrb[7].mxu1  ;;  %v739_v48 = vadd.f32 %v1540_v42, %v699_v37  ;;  %v1828_v37 = vld [vmem:[#allocation8 + $0x20] sm:$0xff]  }
 0x164   :  { %v779_v49 = vadd.f32 %v1562_v43, %v739_v48 }
 0x166   :  { %1832 = vtanh.f32 %v779_v49  ;;  %v1469_v49 = vld [vmem:[%s2140_s4 + $0x5] ss:$0 sm:$0xff] }
 0x170   :  { %v1833_v50 = vpop.eup %1832 }
 0x171   :  { %v785_v51 = vpack.c.bf16 %v1833_v50, %v1833_v50 }
 0x173   :  { %1628 = vmatmul.mubr.bf16.vlgmr.msra.gmra.mrb[8].mxu0 %v785_v51 }
 0x174   :  { %1667 = vmatprep.mubr.msk.bf16.mxu0 %vm1967_vm0, %v1966_v13  ;;  %1652 = vmatpush3.bf16.msra.mxu0 %v1808_v56 }
 0x175   :  { %1653 = vmatprep.subr.bf16.mxu0 %v1966_v13 }
 0x178   :  { %1654 = vmatpush3.bf16.msra.mxu0 %v1809_v57 }
 0x179   :  { %1655 = vmatprep.subr.bf16.mxu0 %v1966_v13 }
 0x17c   :  { %1656 = vmatpush3.bf16.msra.mxu0 %v1810_v58 }
 0x17d   :  { %1657 = vmatprep.subr.bf16.mxu0 %v1966_v13 }
 0x180   :  { %1658 = vmatpush3.bf16.msra.mxu0 %v1811_v59 }
 0x181   :  { %1659 = vmatprep.subr.bf16.mxu0 %v1966_v13 }
 0x184   :  { %1660 = vmatpush3.bf16.msra.mxu0 %v1812_v4 }
 0x185   :  { %1661 = vmatprep.subr.bf16.mxu0 %v1966_v13 }
 0x188   :  { %1662 = vmatpush3.bf16.msra.mxu0 %v1813_v5 }
 0x189   :  { %1663 = vmatprep.subr.bf16.mxu0 %v1966_v13 }
 0x18c   :  { %1664 = vmatpush3.bf16.msra.mxu0 %v1814_v6 }
 0x18d   :  { %1665 = vmatprep.subr.bf16.mxu0 %v1966_v13 }
 0x190   :  { %1666 = vmatpush3.bf16.msra.mxu0 %v1815_v7 }
 0x191   :  { %1691 = vmatprep.subr.bf16.mxu0 %v1966_v13 }
 0x246   :  { %v889_v61 = vpop.f32.mrb[8].mxu0 }
 0x247   :  { %v890_v62 = vadd.f32 %v1433_v60, %v889_v61  ;;  %v1629_v63 = vpop.f32.mrb[9].mxu0 }
 0x248   :  { %v892_v0 = vpop.f32.mrb[10].mxu0 }
 0x249   :  { %1834 = vtanh.f32 %v890_v62  ;;  %v1630_v1 = vpop.f32.mrb[11].mxu0 }
 0x253   :  { %v1835_v2 = vpop.eup %1834 }
 0x254   :  { %v896_v3 = vpack.c.bf16 %v1835_v2, %v1835_v2 }
 0x256   :  { %1648 = vmatmul.mubr.bf16.vlgmr.msra.gmra.mrb[8].mxu1 %v896_v3 }
 0x257   :  { %1687 = vmatprep.mubr.msk.bf16.mxu1 %vm1967_vm0, %v1966_v13  ;;  %1672 = vmatpush3.bf16.msra.mxu1 %v1816_v8 }
 0x258   :  { %1673 = vmatprep.subr.bf16.mxu1 %v1966_v13 }
 0x25b   :  { %1674 = vmatpush3.bf16.msra.mxu1 %v1817_v9 }
 0x25c   :  { %1675 = vmatprep.subr.bf16.mxu1 %v1966_v13 }
 0x25f   :  { %1676 = vmatpush3.bf16.msra.mxu1 %v1818_v10 }
 0x260   :  { %1677 = vmatprep.subr.bf16.mxu1 %v1966_v13 }
 0x263   :  { %1678 = vmatpush3.bf16.msra.mxu1 %v1819_v11 }
 0x264   :  { %1679 = vmatprep.subr.bf16.mxu1 %v1966_v13 }
 0x267   :  { %1680 = vmatpush3.bf16.msra.mxu1 %v1820_v21 }
 0x268   :  { %1681 = vmatprep.subr.bf16.mxu1 %v1966_v13 }
 0x26b   :  { %1682 = vmatpush3.bf16.msra.mxu1 %v1821_v22 }
 0x26c   :  { %1683 = vmatprep.subr.bf16.mxu1 %v1966_v13 }
 0x26f   :  { %1684 = vmatpush3.bf16.msra.mxu1 %v1822_v23 }
 0x270   :  { %1685 = vmatprep.subr.bf16.mxu1 %v1966_v13 }
 0x273   :  { %1686 = vmatpush3.bf16.msra.mxu1 %v1823_v24 }
 0x329   :  { %v1001_v14 = vpop.f32.mrb[8].mxu1 }
 0x32a   :  { %v1002_v15 = vadd.f32 %v1442_v12, %v1001_v14  ;;  %v1649_v16 = vpop.f32.mrb[9].mxu1 }
 0x32b   :  { %v1004_v17 = vpop.f32.mrb[10].mxu1 }
 0x32c   :  { %1836 = vtanh.f32 %v1002_v15  ;;  %v1650_v18 = vpop.f32.mrb[11].mxu1 }
 0x336   :  { %v1837_v19 = vpop.eup %1836 }
 0x337   :  { %v1008_v20 = vpack.c.bf16 %v1837_v19, %v1837_v19 }
 0x339   :  { %1668 = vmatmul.mubr.bf16.vlgmr.msra.gmra.mrb[12].mxu0 %v1008_v20 }
 0x33a   :  { %1707 = vmatprep.mubr.msk.bf16.mxu0 %vm1967_vm0, %v1966_v13  ;;  %1692 = vmatpush3.bf16.msra.mxu0 %v1824_v25 }
 0x33b   :  { %1693 = vmatprep.subr.bf16.mxu0 %v1966_v13 }
 0x33e   :  { %1694 = vmatpush3.bf16.msra.mxu0 %v1825_v26 }
 0x33f   :  { %1695 = vmatprep.subr.bf16.mxu0 %v1966_v13 }
 0x342   :  { %1696 = vmatpush3.bf16.msra.mxu0 %v1826_v27 }
 0x343   :  { %1697 = vmatprep.subr.bf16.mxu0 %v1966_v13 }
 0x346   :  { %1698 = vmatpush3.bf16.msra.mxu0 %v1827_v28 }
 0x347   :  { %1699 = vmatprep.subr.bf16.mxu0 %v1966_v13 }
 0x34a   :  { %1700 = vmatpush3.bf16.msra.mxu0 %v1828_v37 }
 0x34b   :  { %1701 = vmatprep.subr.bf16.mxu0 %v1966_v13 }
 0x34e   :  { %1702 = vmatpush3.bf16.msra.mxu0 %v1829_v38 }
 0x34f   :  { %1703 = vmatprep.subr.bf16.mxu0 %v1966_v13 }
 0x352   :  { %1704 = vmatpush3.bf16.msra.mxu0 %v1830_v39 }
 0x353   :  { %1705 = vmatprep.subr.bf16.mxu0 %v1966_v13 }
 0x356   :  { %1706 = vmatpush3.bf16.msra.mxu0 %v1831_v40 }
 0x40c   :  { %v1113_v30 = vpop.f32.mrb[12].mxu0 }
 0x40d   :  { %v1114_v31 = vadd.f32 %v1451_v29, %v1113_v30  ;;  %v1669_v32 = vpop.f32.mrb[13].mxu0 }
 0x40e   :  { %v1116_v33 = vpop.f32.mrb[14].mxu0 }
 0x40f   :  { %1838 = vtanh.f32 %v1114_v31  ;;  %v1670_v34 = vpop.f32.mrb[15].mxu0 }
 0x419   :  { %v1839_v35 = vpop.eup %1838 }
 0x41a   :  { %v1120_v36 = vpack.c.bf16 %v1839_v35, %v1839_v35 }
 0x41c   :  { %1688 = vmatmul.mubr.bf16.vlgmr.msra.gmra.mrb[12].mxu1 %v1120_v36 }
 0x4ef   :  { %v1225_v42 = vpop.f32.mrb[12].mxu1 }
 0x4f0   :  { %v1226_v43 = vadd.f32 %v1460_v41, %v1225_v42  ;;  %v1689_v44 = vpop.f32.mrb[13].mxu1 }
 0x4f1   :  { %v1228_v45 = vpop.f32.mrb[14].mxu1 }
 0x4f2   :  { %1840 = vtanh.f32 %v1226_v43  ;;  %v1690_v46 = vpop.f32.mrb[15].mxu1 }
 0x4fc   :  { %v1841_v47 = vpop.eup %1840 }
 0x4fd   :  { %v1232_v48 = vpack.c.bf16 %v1841_v47, %v1841_v47 }
 0x4ff   :  { %1708 = vmatmul.mubr.bf16.vlgmr.msra.gmra.mrb[16].mxu0 %v1232_v48 }
 0x5d2   :  { %v1336_v13 = vpop.f32.mrb[16].mxu0 }
 0x5d3   :  { %v1337_v50 = vadd.f32 %v1469_v49, %v1336_v13  ;;  %v1709_v51 = vpop.f32.mrb[17].mxu0 }
 0x5d4   :  { %v1339_v52 = vpop.f32.mrb[18].mxu0 }
 0x5d5   :  { %1342 = vst [vmem:[#allocation10] sm:$0xff] %v1337_v50  ;;  %v1710_v53 = vpop.f32.mrb[19].mxu0 }
 0x5d6   :  { %1941 = shalt.err (!%p1938_p8)
}
 0x5d7   :  { %s1942_s4 = scalar_lea.hbm %s2141_s5, 128 }
 0x5d8   :  { %p1943_p9 = scmp.ne.s32.totalorder %s2141_s5, %s1942_s4  ;;  %p1946_p10 = scmp.lt.u32.totalorder %s1942_s4, %s2141_s5 }
 0x5da   :  { %p1948_p11 = pnand %p1946_p10, %p1943_p9 }
 0x5dc   :  { %1951 = shalt.err (!%p1948_p11)
}
 0x5dd   :  { %1352 = dma.vmem_to_hbm [thread:$0]  %s1350_s26, 128, %s2141_s5, [#allocation4]  }
 0x5de   :  { %1958 = dma.done.wait [#allocation4], 128  }
 0x5df   :  { %1959 = vsyncadd [#allocation4], 4294967168 }
 0x5e0   :  { %1356 = vsyncpa [#allocation3], 1 }
 0x5e1   :  { %1357 = vsyncpa [#allocation6], 1 }
 0x5e2   :  { %1358 = vsyncpa [#allocation9], 1 }
 0x5e3   :  { %1359 = vsyncpa [#allocation4], 1 }

</bundles_post_ra>
